<compile_context>
chip_gen: v6e
topology: v6e:2x2x1
jax: 0.10.0
libtpu: 0.0.40
codegen_flags: <defaults>
</compile_context>

<pallas_src>
import jax
import jax.numpy as jnp
from jax.experimental import pallas as pl
from jax.experimental.pallas import tpu as pltpu


_MAX_TILE_N = 2048                       # diminishing returns past ~1024 rows
_TILE_VMEM_BUDGET = 32 * 1024 * 1024     # pipeline buffers + f32 compute temps
_VMEM_LIMIT_BYTES = 48 * 1024 * 1024     # < 64 MiB physical on v7x; fine on v5e/v6e


def _cdiv(a, b):
    return -(-a // b)


def _round_up(a, b):
    return _cdiv(a, b) * b


def _choose_tile_n(n, c, x_dtype, t_dtype):
    """Largest row tile (multiple of 8) whose working set fits the VMEM budget."""
    xb = jnp.dtype(x_dtype).itemsize
    tb = jnp.dtype(t_dtype).itemsize
    # 2 pipeline buffers per input stream + ~4 f32-sized live temps per tile.
    bytes_per_row = 2 * c * (xb + tb) + 4 * c * 4
    max_rows = max(_TILE_VMEM_BUDGET // bytes_per_row, 8)
    max_tile = max(min(_MAX_TILE_N, (max_rows // 8) * 8), 8)
    # Even out tiles to minimize zero-padding waste.
    num_tiles = _cdiv(n, max_tile)
    tile_n = min(max_tile, _round_up(_cdiv(n, num_tiles), 8))
    return tile_n


def _soft_ce_kernel(x_ref, t_ref, o_ref):
    x = x_ref[...].astype(jnp.float32)                      # (tile_n, C)
    t = t_ref[...].astype(jnp.float32)                      # (tile_n, C)

    # Numerically stable, folded soft cross entropy (log_softmax never built):
    #   row_loss = sum(-t * (shifted - lse)) = lse * sum(t) - sum(t * shifted)
    m = jnp.max(x, axis=-1, keepdims=True)                  # (tile_n, 1)
    shifted = x - m
    lse = jnp.log(jnp.sum(jnp.exp(shifted), axis=-1, keepdims=True))  # (tile_n, 1)
    t_sum = jnp.sum(t, axis=-1, keepdims=True)              # (tile_n, 1)
    tx_sum = jnp.sum(t * shifted, axis=-1, keepdims=True)   # (tile_n, 1)

    o_ref[...] = lse * t_sum - tx_sum                       # (tile_n, 1) per-row loss


def soft_target_cross_entropy(x, target, *, tile_n=None):
    """x, target: (N, C). Returns scalar float32 mean soft cross-entropy.

    Pass bf16 inputs directly (do not pre-cast to f32); the kernel upcasts.
    """
    assert x.shape == target.shape and x.ndim == 2
    n, c = x.shape
    if tile_n is None:
        tile_n = _choose_tile_n(n, c, x.dtype, target.dtype)
    tile_n = max((tile_n // 8) * 8, 8)

    num_tiles = _cdiv(n, tile_n)
    n_padded = num_tiles * tile_n
    if n_padded != n:
        pad = n_padded - n
        # Zero target rows contribute exactly 0 to the loss sum.
        x = jnp.pad(x, ((0, pad), (0, 0)))
        target = jnp.pad(target, ((0, pad), (0, 0)))

    row_losses = pl.pallas_call(
        _soft_ce_kernel,
        out_shape=jax.ShapeDtypeStruct((n_padded, 1), jnp.float32),
        grid_spec=pltpu.PrefetchScalarGridSpec(
            num_scalar_prefetch=0,
            grid=(num_tiles,),
            in_specs=[
                pl.BlockSpec((tile_n, c), lambda i: (i, 0)),
                pl.BlockSpec((tile_n, c), lambda i: (i, 0)),
            ],
            out_specs=pl.BlockSpec((tile_n, 1), lambda i: (i, 0)),
        ),
        compiler_params=pltpu.CompilerParams(
            # Per-tile outputs -> no shared accumulator -> safe to parallelize
            # across TensorCores (2x on v7x megacore; no-op on v5e/v6e).
            dimension_semantics=("parallel",),
            vmem_limit_bytes=_VMEM_LIMIT_BYTES,
        ),
    )(x, target)

    # Final mean (tree reduction) in plain XLA; divide by the *original* N.
    return jnp.sum(row_losses) / jnp.float32(n)


def _reference(x, target):
    x = x.astype(jnp.float32)
    target = target.astype(jnp.float32)
    log_sm = jax.nn.log_softmax(x, axis=-1)
    return jnp.mean(jnp.sum(-target * log_sm, axis=-1))


if __name__ == "__main__":
    key = jax.random.PRNGKey(0)
    k1, k2, k3, k4 = jax.random.split(key, 4)

    # Case 1: small f32 batch, lane-aligned class count.
    N, C = 8, 128
    x = jax.random.normal(k1, (N, C), dtype=jnp.float32)
    target = jax.nn.softmax(jax.random.normal(k2, (N, C), dtype=jnp.float32), axis=-1)
    loss = jax.block_until_ready(soft_target_cross_entropy(x, target))
    ref = _reference(x, target)
    assert jnp.allclose(loss, ref, rtol=1e-5, atol=1e-5), (loss, ref)

    # Case 2: bf16 inputs, ragged row count (exercises padding + masking-by-zeros).
    N2, C2 = 10, 160
    x2 = jax.random.normal(k3, (N2, C2), dtype=jnp.float32).astype(jnp.bfloat16)
    t2 = jax.nn.softmax(
        jax.random.normal(k4, (N2, C2), dtype=jnp.float32), axis=-1
    ).astype(jnp.bfloat16)
    loss2 = jax.block_until_ready(soft_target_cross_entropy(x2, t2))
    ref2 = _reference(x2, t2)
    assert jnp.allclose(loss2, ref2, rtol=1e-4, atol=1e-4), (loss2, ref2)

    print("KERNEL_OK")
</pallas_src>

<mosaic_0001>
module attributes {stable_mosaic.version = 11 : i64} {
  func.func @_soft_ce_kernel(%arg0: i32, %arg1: memref<8x128xf32, #tpu.memory_space<vmem>>, %arg2: memref<8x128xf32, #tpu.memory_space<vmem>>, %arg3: memref<8x1xf32, #tpu.memory_space<vmem>>) attributes {dimension_semantics = [#tpu.dimension_semantics<parallel>], iteration_bounds = array<i64: 1>, scalar_prefetch = 0 : i64, scratch_operands = 0 : i64, tpu.core_type = #tpu.core_type<tc>, window_params = [{transform_indices = @transform_0, window_bounds = array<i64: 8, 128>}, {transform_indices = @transform_1, window_bounds = array<i64: 8, 128>}, {transform_indices = @transform_2, window_bounds = array<i64: 8, 1>}]} {
    %c0 = arith.constant 0 : index
    %c0_0 = arith.constant 0 : index
    %0 = vector.load %arg1[%c0, %c0_0] : memref<8x128xf32, #tpu.memory_space<vmem>>, vector<8x128xf32>
    %c0_1 = arith.constant 0 : index
    %c0_2 = arith.constant 0 : index
    %1 = vector.load %arg2[%c0_1, %c0_2] : memref<8x128xf32, #tpu.memory_space<vmem>>, vector<8x128xf32>
    %cst = arith.constant dense<0xFF800000> : vector<8xf32>
    %2 = vector.multi_reduction <maximumf>, %0, %cst [1] : vector<8x128xf32> to vector<8xf32>
    %3 = vector.shape_cast %2 : vector<8xf32> to vector<8x1xf32>
    %4 = vector.broadcast %3 : vector<8x1xf32> to vector<8x128xf32>
    %5 = arith.subf %0, %4 : vector<8x128xf32>
    %6 = math.exp %5 : vector<8x128xf32>
    %cst_3 = arith.constant dense<0.000000e+00> : vector<8xf32>
    %7 = vector.multi_reduction <add>, %6, %cst_3 [1] : vector<8x128xf32> to vector<8xf32>
    %8 = vector.shape_cast %7 : vector<8xf32> to vector<8x1xf32>
    %9 = math.log %8 : vector<8x1xf32>
    %cst_4 = arith.constant dense<0.000000e+00> : vector<8xf32>
    %10 = vector.multi_reduction <add>, %1, %cst_4 [1] : vector<8x128xf32> to vector<8xf32>
    %11 = vector.shape_cast %10 : vector<8xf32> to vector<8x1xf32>
    %12 = arith.mulf %1, %5 : vector<8x128xf32>
    %cst_5 = arith.constant dense<0.000000e+00> : vector<8xf32>
    %13 = vector.multi_reduction <add>, %12, %cst_5 [1] : vector<8x128xf32> to vector<8xf32>
    %14 = vector.shape_cast %13 : vector<8xf32> to vector<8x1xf32>
    %15 = arith.mulf %9, %11 : vector<8x1xf32>
    %16 = arith.subf %15, %14 : vector<8x1xf32>
    %c0_6 = arith.constant 0 : index
    %c0_7 = arith.constant 0 : index
    %17 = vector.load %arg3[%c0_6, %c0_7] : memref<8x1xf32, #tpu.memory_space<vmem>>, vector<8x1xf32>
    tpu.vector_store %arg3[%c0_6, %c0_7], %16 {strides = array<i32>} : memref<8x1xf32, #tpu.memory_space<vmem>>, vector<8x1xf32>,
    return
  }
  func.func @transform_0(%arg0: i32) -> (i32, i32) {
    %c0_i32 = arith.constant 0 : i32
    %c0_i32_0 = arith.constant 0 : i32
    return %arg0, %c0_i32 : i32, i32
  }
  func.func @transform_1(%arg0: i32) -> (i32, i32) {
    %c0_i32 = arith.constant 0 : i32
    %c0_i32_0 = arith.constant 0 : i32
    return %arg0, %c0_i32 : i32, i32
  }
  func.func @transform_2(%arg0: i32) -> (i32, i32) {
    %c0_i32 = arith.constant 0 : i32
    %c0_i32_0 = arith.constant 0 : i32
    return %arg0, %c0_i32 : i32, i32
  }
}

</mosaic_0001>

<bundles_post_ra>
// kernel: tpu_custom_call.1
= control target key start
LH: loop header
LB: loop body
LE: loop exit
PB: predicated region body
PF: predicated region fallthrough
CT: control target
= control target key end

     0   :  { %7 = vsyncpa [#allocation3], 0  ;;  %s137_s0 = inlined_call_operand.hbm [shape: f32[8,128], index: 0, kind: input, shape index: {}]   ;;  %s138_s1 = inlined_call_operand.hbm [shape: f32[8,128], index: 1, kind: input, shape index: {}]   ;;  %s139_s2 = inlined_call_operand.vmem [shape: f32[8,1], index: 2, kind: output, shape index: {}]  }
   0x1   :  { %8 = vsyncpa [#allocation5], 0  ;;  %s111_s9 = smov [#allocation2]   ;;  %s112_s11 = smov [#allocation4]  }
   0x2   :  { %s15_s10 = sshll.u32 %s111_s9, 4  ;;  %s25_s12 = sshll.u32 %s112_s11, 4  ;;  %s16_s10 = int_to_ptr.vmem [resolvable:$true] %s15_s10  ;;  %s26_s12 = int_to_ptr.vmem [resolvable:$true] %s25_s12 }
   0x3   :  { %s75_s13 = scalar_lea.vmem %s16_s10, 128  ;;  %p80_p1 = scmp.lt.s32.totalorder %s16_s10, %s16_s10 }
   0x4   :  { %p76_p0 = scmp.ne.s32.totalorder %s16_s10, %s75_s13  ;;  %p81_p2 = scmp.lt.s32.totalorder %s75_s13, %s75_s13 }
   0x6   :  { %p82_p3 = por %p81_p2, %p80_p1 }
   0x8   :  { %p83_p4 = pnand %p82_p3, %p76_p0 }
   0xa   :  { %86 = shalt.err (!%p83_p4)
}
   0xb   :  { %18 = dma.hbm_to_vmem [thread:$0]  %s137_s0, 128, %s16_s10, [#allocation3]  }
   0xc   :  { %s95_s16 = scalar_lea.vmem %s26_s12, 128  ;;  %p100_p6 = scmp.lt.s32.totalorder %s26_s12, %s26_s12 }
   0xd   :  { %p96_p5 = scmp.ne.s32.totalorder %s26_s12, %s95_s16  ;;  %p101_p7 = scmp.lt.s32.totalorder %s95_s16, %s95_s16 }
   0xf   :  { %p102_p8 = por %p101_p7, %p100_p6 }
  0x11   :  { %p103_p9 = pnand %p102_p8, %p96_p5 }
  0x13   :  { %106 = shalt.err (!%p103_p9)
}
  0x14   :  { %28 = dma.hbm_to_vmem [thread:$0]  %s138_s1, 128, %s26_s12, [#allocation5]  }
  0x15   :  { %107 = dma.done.wait [#allocation3], 128  }
  0x16   :  { %108 = vsyncadd [#allocation3], 4294967168 }
  0x17   :  { %109 = dma.done.wait [#allocation5], 128  }
  0x18   :  { %110 = vsyncadd [#allocation5], 4294967168  ;;  %v35_v0 = vld [vmem:[#allocation2] sm:$0xff]  ;;  %v36_v1 = vld [vmem:[#allocation4] sm:$0xff]  ;;  %vm53_vm0 = vcmask 7168  }
  0x19   :  { %37 = vmax.xlane.f32.xlu0 %v35_v0  ;;  %46 = vadd.xlane.f32.xlu1 %v36_v1 }
  0xa2   :  { %v38_v2 = vpop.xlane.xlu0 %37  ;;  %v47_v8 = vpop.xlane.xlu1 %46 }
  0xa3   :  { %v39_v3 = vsub.f32 %v35_v0, %v38_v2 }
  0xa5   :  { %v40_v4 = vmul.f32 1.442695, %v39_v3  ;;  %v48_v5 = vmul.f32 %v39_v3, %v36_v1 }
  0xa7   :  { %63 = vpow2.f32 %v40_v4  ;;  %49 = vadd.xlane.f32.xlu1 %v48_v5 }
  0xb4   :  { %v64_v6 = vpop.eup %63 }
  0xb5   :  { %42 = vadd.xlane.f32.xlu0 %v64_v6 }
 0x130   :  { %v50_v12 = vpop.xlane.xlu1 %49 }
 0x13e   :  { %v43_v7 = vpop.xlane.xlu0 %42 }
 0x13f   :  { %65 = vlog2.f32 %v43_v7 }
 0x14c   :  { %v66_v9 = vpop.eup %65 }
 0x14d   :  { %v45_v10 = vmul.f32 0.6931472, %v66_v9 }
 0x14f   :  { %v51_v11 = vmul.f32 %v47_v8, %v45_v10 }
 0x151   :  { %v52_v13 = vsub.f32 %v51_v11, %v50_v12 }
 0x153   :  { %54 = vst.msk [vmem:[%s139_s2] sm:$0xff] %vm53_vm0, %v52_v13 }
 0x154   :  { %59 = vsyncpa [#allocation3], 1 }
 0x155   :  { %60 = vsyncpa [#allocation5], 1 }

</bundles_post_ra>
